<compile_context>
chip_gen: v7x
topology: tpu7x:2x2x1
jax: 0.10.0
libtpu: 0.0.40
codegen_flags: <defaults>
</compile_context>

<pallas_src>
import jax
import jax.numpy as jnp
from jax.experimental import pallas as pl
from jax.experimental.pallas import tpu as pltpu


def _round_up(n, m):
    return ((n + m - 1) // m) * m


def ann_kernel(x_ref, w1_ref, b1_ref, w2_ref, b2_ref, w3_ref, b3_ref, o_ref):
    # x_ref: (TB, 1500) f32 or bf16 ; w1: (1500,128) bf16 ; w2: (128,64) bf16 ;
    # w3: (1,64) f32 row ; biases (1,N) f32 ; o_ref: (TB, 1) f32.
    # In-kernel cast (no-op if the input pipeline already delivers bf16).
    x = x_ref[...].astype(jnp.bfloat16)

    # fc1 + ReLU : bf16 MXU matmul, f32 accumulation.
    h1 = jnp.dot(x, w1_ref[...], preferred_element_type=jnp.float32)   # (TB,128)
    h1 = jnp.maximum(h1 + b1_ref[...], 0.0)

    # fc2 + ReLU : bf16 MXU matmul, f32 accumulation.
    h2 = jnp.dot(h1.astype(jnp.bfloat16), w2_ref[...],
                 preferred_element_type=jnp.float32)                   # (TB,64)
    h2 = jnp.maximum(h2 + b2_ref[...], 0.0)

    # fc3 (64 -> 1): N=1 would waste the systolic array; do it on the VPU/XLU.
    o = jnp.sum(h2 * w3_ref[...], axis=-1, keepdims=True) + b3_ref[...]  # (TB,1)
    o_ref[...] = o.astype(o_ref.dtype)


def ann_forward(x, params, *, block_b=None):
    """x: (B, 3, 500) float32 or bfloat16. Returns (B, 1) float32."""
    w1, b1, w2, b2, w3, b3 = params
    B = x.shape[0]

    # Flatten exactly like torch's x.view(B, -1). Contiguous reshape: free, no
    # HBM pass. The bf16 cast happens inside the kernel.
    x2d = x.reshape(B, -1)
    K = x2d.shape[1]  # 1500
    w1 = w1.astype(jnp.bfloat16)
    w2 = w2.astype(jnp.bfloat16)

    # Default batch tile keeps the double-buffered x window at ~12 MiB
    # regardless of input dtype (fits comfortably in the 32 MiB scoped VMEM on
    # every generation, including v7x's 64 MiB/TC).
    if block_b is None:
        block_b = 2048 if jnp.dtype(x2d.dtype).itemsize <= 2 else 1024
    block_b = max(16, _round_up(block_b, 16))

    # Cap the tile so there are >= 2 grid steps: lets the "parallel" batch axis
    # split across both TensorCores on v7x instead of idling one core.
    tb = min(block_b, max(16, _round_up(pl.cdiv(B, 2), 16)))

    # No jnp.pad: ragged last block is masked by Pallas. Garbage rows in the
    # last tile only affect their own (discarded) output rows — rows are
    # independent through every layer.
    # NOTE: do not add cross-row reductions to this kernel without re-adding
    # explicit masking of the padded rows.
    grid = (pl.cdiv(B, tb),)

    const = lambda shape: pl.BlockSpec(shape, lambda i: tuple(0 for _ in shape))

    flops = 2 * B * (K * 128 + 128 * 64 + 64)
    bytes_accessed = (
        B * K * jnp.dtype(x2d.dtype).itemsize        # dominant x stream
        + (w1.size + w2.size) * 2                    # bf16 weights
        + (b1.size + b2.size + w3.size + b3.size) * 4
        + B * 4                                      # f32 output
    )

    out = pl.pallas_call(
        ann_kernel,
        out_shape=jax.ShapeDtypeStruct((grid[0] * tb, 1), jnp.float32),
        grid_spec=pltpu.PrefetchScalarGridSpec(
            num_scalar_prefetch=0,
            grid=grid,
            in_specs=[
                pl.BlockSpec((tb, K), lambda i: (i, 0)),   # x streams over batch
                const(w1.shape), const(b1.shape),          # weights stay resident
                const(w2.shape), const(b2.shape),
                const(w3.shape), const(b3.shape),
            ],
            out_specs=pl.BlockSpec((tb, 1), lambda i: (i, 0)),
        ),
        compiler_params=pltpu.CompilerParams(
            dimension_semantics=("parallel",),      # megacore split on v7x
            vmem_limit_bytes=32 * 1024 * 1024,      # explicit; v5e default is 16 MiB
        ),
        cost_estimate=pl.CostEstimate(
            flops=flops, transcendentals=0, bytes_accessed=bytes_accessed),
    )(x2d, w1, b1, w2, b2, w3, b3)

    return out[:B]


def init_params(key):
    """PyTorch-default Linear init. fc1/fc2 weights stored as (in, out); fc3
    weight stored as a (1, 64) row (same as PyTorch's fc3.weight); biases (1, out)."""
    shapes = [(3 * 500, 128), (128, 64), (64, 1)]
    params = []
    for fan_in, fan_out in shapes:
        key, kw, kb = jax.random.split(key, 3)
        bound = 1.0 / jnp.sqrt(fan_in)
        w = jax.random.uniform(kw, (fan_in, fan_out), jnp.float32, -bound, bound)
        b = jax.random.uniform(kb, (1, fan_out), jnp.float32, -bound, bound)
        params.extend([w, b])
    w1, b1, w2, b2, w3, b3 = params
    w3 = w3.reshape(1, 64)  # row layout for the in-kernel VPU reduction
    return (w1, b1, w2, b2, w3, b3)


def reference_forward_f32(x, params):
    """Full-f32 reference (matches the PyTorch module numerics)."""
    w1, b1, w2, b2, w3, b3 = params
    h = x.reshape(x.shape[0], -1).astype(jnp.float32)
    h = jnp.maximum(h @ w1 + b1, 0.0)
    h = jnp.maximum(h @ w2 + b2, 0.0)
    return h @ w3.T + b3


def reference_forward_bf16(x, params):
    """Reference with the same bf16-in / f32-accumulate scheme as the kernel.
    NOTE: the kernel intentionally quantizes x/w1/w2 to bf16 (f32 accumulation);
    consumers expecting bit-level parity with the f32 PyTorch module should use
    the looser tolerance below."""
    w1, b1, w2, b2, w3, b3 = params
    h = x.reshape(x.shape[0], -1).astype(jnp.bfloat16)
    h = jnp.dot(h, w1.astype(jnp.bfloat16), preferred_element_type=jnp.float32)
    h = jnp.maximum(h + b1, 0.0)
    h = jnp.dot(h.astype(jnp.bfloat16), w2.astype(jnp.bfloat16),
                preferred_element_type=jnp.float32)
    h = jnp.maximum(h + b2, 0.0)
    return jnp.sum(h * w3, axis=-1, keepdims=True) + b3


if __name__ == "__main__":
    key = jax.random.PRNGKey(0)
    kx, kp = jax.random.split(key)

    B = 20  # not a multiple of the tile -> exercises the ragged (masked) last block
    x = jax.random.normal(kx, (B, 3, 500), jnp.float32)
    params = init_params(kp)

    # f32 input path: in-kernel bf16 cast, >=2 grid steps (tb=16, ragged last block).
    out_f32_in = jax.block_until_ready(ann_forward(x, params))
    # bf16 input path: models an upstream pipeline that already delivers bf16.
    out_bf16_in = jax.block_until_ready(ann_forward(x.astype(jnp.bfloat16), params))

    ref_bf16 = reference_forward_bf16(x, params)
    ref_f32 = reference_forward_f32(x, params)

    assert out_f32_in.shape == (B, 1)
    assert out_bf16_in.shape == (B, 1)
    # Tight check against the numerically-matched (bf16-in, f32-acc) reference.
    assert jnp.allclose(out_f32_in, ref_bf16, atol=1e-3, rtol=1e-3)
    assert jnp.allclose(out_bf16_in, ref_bf16, atol=1e-3, rtol=1e-3)
    # Loose check against the f32 (PyTorch-equivalent) reference (bf16 rounding).
    assert jnp.allclose(out_f32_in, ref_f32, atol=5e-2, rtol=5e-2)
    assert jnp.allclose(out_bf16_in, ref_f32, atol=5e-2, rtol=5e-2)

    print("KERNEL_OK")
</pallas_src>

<mosaic_0001>
module attributes {stable_mosaic.version = 11 : i64} {
  func.func @ann_kernel(%arg0: i32, %arg1: memref<16x1500xf32, #tpu.memory_space<vmem>>, %arg2: memref<1500x128xbf16, #tpu.memory_space<vmem>>, %arg3: memref<1x128xf32, #tpu.memory_space<vmem>>, %arg4: memref<128x64xbf16, #tpu.memory_space<vmem>>, %arg5: memref<1x64xf32, #tpu.memory_space<vmem>>, %arg6: memref<1x64xf32, #tpu.memory_space<vmem>>, %arg7: memref<1x1xf32, #tpu.memory_space<vmem>>, %arg8: memref<16x1xf32, #tpu.memory_space<vmem>>) attributes {dimension_semantics = [#tpu.dimension_semantics<parallel>], iteration_bounds = array<i64: 2>, scalar_prefetch = 0 : i64, scratch_operands = 0 : i64, tpu.core_type = #tpu.core_type<tc>, window_params = [{transform_indices = @transform_0, window_bounds = array<i64: 16, 1500>}, {pipeline_mode = #tpu.pipeline_mode<synchronous>, transform_indices = @transform_1, window_bounds = array<i64: 1500, 128>}, {pipeline_mode = #tpu.pipeline_mode<synchronous>, transform_indices = @transform_2, window_bounds = array<i64: 1, 128>}, {pipeline_mode = #tpu.pipeline_mode<synchronous>, transform_indices = @transform_3, window_bounds = array<i64: 128, 64>}, {pipeline_mode = #tpu.pipeline_mode<synchronous>, transform_indices = @transform_4, window_bounds = array<i64: 1, 64>}, {pipeline_mode = #tpu.pipeline_mode<synchronous>, transform_indices = @transform_5, window_bounds = array<i64: 1, 64>}, {pipeline_mode = #tpu.pipeline_mode<synchronous>, transform_indices = @transform_6, window_bounds = array<i64: 1, 1>}, {transform_indices = @transform_7, window_bounds = array<i64: 16, 1>}]} {
    %c0 = arith.constant 0 : index
    %c0_0 = arith.constant 0 : index
    %0 = vector.load %arg1[%c0, %c0_0] : memref<16x1500xf32, #tpu.memory_space<vmem>>, vector<16x1500xf32>
    %1 = arith.truncf %0 : vector<16x1500xf32> to vector<16x1500xbf16>
    %c0_1 = arith.constant 0 : index
    %c0_2 = arith.constant 0 : index
    %2 = vector.load %arg2[%c0_1, %c0_2] : memref<1500x128xbf16, #tpu.memory_space<vmem>>, vector<1500x128xbf16>
    %cst = arith.constant dense<0.000000e+00> : vector<16x128xf32>
    %3 = tpu.matmul %1, %2, %cst {dimension_numbers = #tpu.dot_dimension_numbers<[1], [0], [0], [1], [0, 0, 1, 1], [], []>} : vector<16x1500xbf16>, vector<1500x128xbf16>, vector<16x128xf32> -> vector<16x128xf32>
    %c0_3 = arith.constant 0 : index
    %c0_4 = arith.constant 0 : index
    %4 = vector.load %arg3[%c0_3, %c0_4] : memref<1x128xf32, #tpu.memory_space<vmem>>, vector<1x128xf32>
    %5 = vector.broadcast %4 : vector<1x128xf32> to vector<16x128xf32>
    %6 = arith.addf %3, %5 : vector<16x128xf32>
    %cst_5 = arith.constant 0.000000e+00 : f32
    %7 = vector.broadcast %cst_5 : f32 to vector<16x128xf32>
    %8 = arith.maximumf %6, %7 : vector<16x128xf32>
    %9 = arith.truncf %8 : vector<16x128xf32> to vector<16x128xbf16>
    %c0_6 = arith.constant 0 : index
    %c0_7 = arith.constant 0 : index
    %10 = vector.load %arg4[%c0_6, %c0_7] : memref<128x64xbf16, #tpu.memory_space<vmem>>, vector<128x64xbf16>
    %cst_8 = arith.constant dense<0.000000e+00> : vector<16x64xf32>
    %11 = tpu.matmul %9, %10, %cst_8 {dimension_numbers = #tpu.dot_dimension_numbers<[1], [0], [0], [1], [0, 0, 1, 1], [], []>} : vector<16x128xbf16>, vector<128x64xbf16>, vector<16x64xf32> -> vector<16x64xf32>
    %c0_9 = arith.constant 0 : index
    %c0_10 = arith.constant 0 : index
    %12 = vector.load %arg5[%c0_9, %c0_10] : memref<1x64xf32, #tpu.memory_space<vmem>>, vector<1x64xf32>
    %13 = vector.broadcast %12 : vector<1x64xf32> to vector<16x64xf32>
    %14 = arith.addf %11, %13 : vector<16x64xf32>
    %cst_11 = arith.constant 0.000000e+00 : f32
    %15 = vector.broadcast %cst_11 : f32 to vector<16x64xf32>
    %16 = arith.maximumf %14, %15 : vector<16x64xf32>
    %c0_12 = arith.constant 0 : index
    %c0_13 = arith.constant 0 : index
    %17 = vector.load %arg6[%c0_12, %c0_13] : memref<1x64xf32, #tpu.memory_space<vmem>>, vector<1x64xf32>
    %18 = vector.broadcast %17 : vector<1x64xf32> to vector<16x64xf32>
    %19 = arith.mulf %16, %18 : vector<16x64xf32>
    %cst_14 = arith.constant dense<0.000000e+00> : vector<16xf32>
    %20 = vector.multi_reduction <add>, %19, %cst_14 [1] : vector<16x64xf32> to vector<16xf32>
    %21 = vector.shape_cast %20 : vector<16xf32> to vector<16x1xf32>
    %c0_15 = arith.constant 0 : index
    %c0_16 = arith.constant 0 : index
    %22 = vector.load %arg7[%c0_15, %c0_16] : memref<1x1xf32, #tpu.memory_space<vmem>>, vector<1x1xf32>
    %23 = vector.broadcast %22 : vector<1x1xf32> to vector<16x1xf32>
    %24 = arith.addf %21, %23 : vector<16x1xf32>
    %c0_17 = arith.constant 0 : index
    %c0_18 = arith.constant 0 : index
    %25 = vector.load %arg8[%c0_17, %c0_18] : memref<16x1xf32, #tpu.memory_space<vmem>>, vector<16x1xf32>
    tpu.vector_store %arg8[%c0_17, %c0_18], %24 {strides = array<i32>} : memref<16x1xf32, #tpu.memory_space<vmem>>, vector<16x1xf32>,
    return
  }
  func.func @transform_0(%arg0: i32) -> (i32, i32) {
    %c0_i32 = arith.constant 0 : i32
    %c0_i32_0 = arith.constant 0 : i32
    return %arg0, %c0_i32 : i32, i32
  }
  func.func @transform_1(%arg0: i32) -> (i32, i32) {
    %c0_i32 = arith.constant 0 : i32
    %c0_i32_0 = arith.constant 0 : i32
    %c0_i32_1 = arith.constant 0 : i32
    return %c0_i32, %c0_i32_0 : i32, i32
  }
  func.func @transform_2(%arg0: i32) -> (i32, i32) {
    %c0_i32 = arith.constant 0 : i32
    %c0_i32_0 = arith.constant 0 : i32
    %c0_i32_1 = arith.constant 0 : i32
    return %c0_i32, %c0_i32_0 : i32, i32
  }
  func.func @transform_3(%arg0: i32) -> (i32, i32) {
    %c0_i32 = arith.constant 0 : i32
    %c0_i32_0 = arith.constant 0 : i32
    %c0_i32_1 = arith.constant 0 : i32
    return %c0_i32, %c0_i32_0 : i32, i32
  }
  func.func @transform_4(%arg0: i32) -> (i32, i32) {
    %c0_i32 = arith.constant 0 : i32
    %c0_i32_0 = arith.constant 0 : i32
    %c0_i32_1 = arith.constant 0 : i32
    return %c0_i32, %c0_i32_0 : i32, i32
  }
  func.func @transform_5(%arg0: i32) -> (i32, i32) {
    %c0_i32 = arith.constant 0 : i32
    %c0_i32_0 = arith.constant 0 : i32
    %c0_i32_1 = arith.constant 0 : i32
    return %c0_i32, %c0_i32_0 : i32, i32
  }
  func.func @transform_6(%arg0: i32) -> (i32, i32) {
    %c0_i32 = arith.constant 0 : i32
    %c0_i32_0 = arith.constant 0 : i32
    %c0_i32_1 = arith.constant 0 : i32
    return %c0_i32, %c0_i32_0 : i32, i32
  }
  func.func @transform_7(%arg0: i32) -> (i32, i32) {
    %c0_i32 = arith.constant 0 : i32
    %c0_i32_0 = arith.constant 0 : i32
    return %arg0, %c0_i32 : i32, i32
  }
}

</mosaic_0001>

<bundles_post_ra>
// kernel: tpu_custom_call.1
= control target key start
LH: loop header
LB: loop body
LE: loop exit
PB: predicated region body
PF: predicated region fallthrough
CT: control target
= control target key end

     0   :  { %s2395_s0 = inlined_call_operand.hbm [shape: f32[20,1500], index: 0, kind: input, shape index: {}]   ;;  %s2396_s1 = inlined_call_operand.hbm [shape: bf16[1500,128], index: 1, kind: input, shape index: {}]   ;;  %s2397_s2 = inlined_call_operand.vmem [shape: f32[1,128], index: 2, kind: input, shape index: {}]   ;;  %s2398_s3 = inlined_call_operand.vmem [shape: bf16[128,64], index: 3, kind: input, shape index: {}]   ;;  %s2399_s4 = inlined_call_operand.vmem [shape: f32[1,64], index: 4, kind: input, shape index: {}]   ;;  %s2400_s5 = inlined_call_operand.vmem [shape: f32[1,64], index: 5, kind: input, shape index: {}]   ;;  %s2401_s6 = inlined_call_operand.<no memory space> [shape: f32[1,1], index: 6, kind: input, shape index: {}]   ;;  %s2402_s7 = inlined_call_operand.vmem [shape: f32[32,1], index: 7, kind: output, shape index: {}]  }
   0x1   :  { %v12_v0 = vstv %s2401_s6 }
   0x2   :  { %13 = vst [vmem:[#allocation2] sm:$0x1] %v12_v0 }
   0x3   :  { %14 = vsyncpa [#allocation4], 0 }
   0x4   :  { %16 = vsyncpa [#allocation4 + $0x1], 0 }
   0x5   :  { %17 = vsyncpa [#allocation6], 0  ;;  %s2170_s26 = smov 0   ;;  %s2172_s27 = smov 0  }
   0x6   :  { %s2174_s28 = smov 0   ;;  %s2176_s29 = smov 0  }
   0x7 LB: > { %s1602_s6 = sadd.s32 4294967295, %s2116_s29   ;;  %s2190_s30 = sadd.s32 1, %s2116_s29   ;;  %s2116_s29 = sphi %s2176_s29, %s2419_s29   ;;  %s2112_s28 = sphi %s2174_s28, %s2418_s28   ;;  %s2108_s27 = sphi %s2172_s27, %s2417_s27   ;;  %s2104_s26 = sphi %s2170_s26, %s2416_s26  }
   0x8   : > { %s27_s8 = ssub.s32 %s2116_s29, %s2190_s30  ;;  %s30_s9 = sadd.s32 1, %s2112_s28 }
   0x9   : > { %p28_p0 = scmp.eq.s32.totalorder %s27_s8, 0  ;;  %p37_p1 = scmp.ne.s32.totalorder %s2112_s28, %s2108_s27 }
   0xa   : > { %p38_p2 = scmp.eq.s32.totalorder %s2116_s29, 0  ;;  %p43_p3 = scmp.ne.s32.totalorder %s2108_s27, %s2104_s26 }
   0xb   : > { %s2200_s10 = scalar_select %p28_p0, %s2112_s28, %s30_s9  }
   0xc   : > { %p2202_p4 = por %p38_p2, %p37_p1  ;;  %p2208_p5 = scmp.eq.s32.totalorder %s1602_s6, 0 }
   0xd   : > { %p1604_p6 = scmp.ge.s32.totalorder %s2116_s29, 1  ;;  %p206_p7 = scmp.lt.s32.totalorder %s2116_s29, 3 }
   0xe   : > { %s2407_s11 = scalar_select %p2202_p4, 1, 0 }
   0xf   : > { %s2408_s12 = scalar_select %p2208_p5, 1, 0 }
  0x10   : > { %p2216_p8 = por %p2208_p5, %p43_p3  ;;  %p2220_p9 = pnand %p1604_p6, %p206_p7 }
  0x11   : > { %s2118_s15 = smov [#allocation5]   ;;  %s2022_s20 = scalar_lea.hbm %s2396_s1, 12032 }
  0x12   : > { %s2409_s13 = scalar_select %p2216_p8, 1, 0 }
  0x13   : > { %s2410_s14 = scalar_select %p2220_p9, 1, 0 }
  0x14   : > { %s218_s16 = sshll.u32 %s2118_s15, 4  ;;  %p1874_p10 = pneg %p2220_p9  ;;  %s219_s16 = int_to_ptr.vmem [resolvable:$true] %s218_s16 }
  0x15   : > { %p2023_p12 = scmp.ne.s32.totalorder %s2396_s1, %s2022_s20  ;;  %p2029_p2 = scmp.lt.u32.totalorder %s2022_s20, %s2396_s1 }
  0x16   : > { %p2228_p11 = pnand %p1874_p10, %p2208_p5 }
  0x18   : > { %p2024_p13 = pneg %p2228_p11 }
  0x1a   : > { %p2025_p0 = pnand %p2024_p13, %p2023_p12 }
  0x1c   : > { %p2026_p1 = pneg %p2025_p0 }
  0x1e   : > { %p2031_p3 = pnand %p2029_p2, %p2026_p1 }
  0x20   : > { %2034 = shalt.err (!%p2031_p3)
}
  0x21   : > { %s2035_s25 = scalar_lea.vmem %s219_s16, 12032  ;;  %p2043_p5 = scmp.lt.s32.totalorder %s219_s16, %s219_s16 }
  0x22   : > { %p2036_p6 = scmp.ne.s32.totalorder %s219_s16, %s2035_s25  ;;  %p2044_p8 = scmp.lt.s32.totalorder %s2035_s25, %s2035_s25 }
  0x24   : > { %p2038_p7 = pnand %p2036_p6, %p2024_p13  ;;  %p2045_p9 = por %p2044_p8, %p2043_p5 }
  0x26   : > { %p2039_p10 = pneg %p2038_p7 }
  0x28   : > { %p2046_p4 = pnand %p2045_p9, %p2039_p10 }
  0x2a   : > { %2049 = shalt.err (!%p2046_p4)
}
  0x2b   : > { %s2119_s26 = smov 64   ;;  %s2120_s8 = smov 4  }
  0x2c   : > { %1877 = dma.hbm_to_vmem [thread:$0]  (!%p2228_p11), %s2396_s1, 12032, %s219_s16, [#allocation6], %s2119_s26, %s2119_s26, %s2120_s8  }
  0x2d   : > { %p1606_p12 = scmp.ge.s32.totalorder %s2116_s29, 2 }
  0x2e   : > { %p2412_p0 = scmp.ne.s32.totalorder (!%p1606_p12), %s2407_s11, 0 }
  0x2f   : > { %243 = sbr.rel (%p1606_p12) target bundleno = 90 (0x5a), region = 40 }
  0x36   : > { %246 = sbr.rel (!%p2412_p0) target bundleno = 90 (0x5a), region = 44  ;;  %s247_s18 = sand.u32 (%p2412_p0), 1, %s2112_s28  }
  0x37   : > { %s1607_s19 = sshll.u32 (%p2412_p0), %s2116_s29, 1  ;;  %s1866_s20 = smul.u32 (%p2412_p0), 192, %s247_s18 }
  0x38   : > { %s253_s21 = ssub.s32 (%p2412_p0), 3, %s1607_s19  ;;  %s2256_s23 = scalar_lea.sflag (%p2412_p0), [#allocation4], %s247_s18 }
  0x39   : > { %p254_p4 = scmp.lt.s32.totalorder (%p2412_p0), %s253_s21, 2  ;;  %s251_s16 = scalar_lea.vmem (%p2412_p0), [#allocation3], %s1866_s20 }
  0x3d   : > { %s2421_s21 = smov (!%p254_p4, %s253_s21), 2 }
  0x3e   : > { %s2253_s22 = smul.u32 1536, %s2421_s21 }
  0x40   : > { %s259_s17 = ssub.s32 3072, %s2253_s22 }
  0x41   : > { %260 = vsyncadd %s2256_s23, %s259_s17  ;;  %p1610_p5 = scmp.ne.s32.totalorder %s2253_s22, 0  ;;  %s1867_s11 = smul.u32 3072, %s2116_s29 }
  0x42   : > { %s266_s24 = sshll.u32 %s251_s16, 4  ;;  %s2054_s19 = scalar_lea.hbm %s2395_s0, 4608  ;;  %s2266_s24 = int_to_ptr.vmem [resolvable:$true] %s266_s24 }
  0x43   : > { %s2264_s8 = scalar_lea.hbm %s2395_s0, %s1867_s11 }
  0x44   : > { %s2050_s9 = scalar_lea.hbm %s2264_s8, %s2253_s22  ;;  %p2055_p13 = scmp.lt.u32.totalorder %s2264_s8, %s2395_s0 }
  0x45   : > { %p2051_p8 = scmp.ne.s32.totalorder %s2264_s8, %s2050_s9  ;;  %p2056_p1 = scmp.lt.u32.totalorder %s2054_s19, %s2050_s9 }
  0x46   : > { %p2058_p3 = scmp.lt.u32.totalorder %s2050_s9, %s2264_s8 }
  0x47   : > { %p2052_p9 = pnand %p2051_p8, %p1610_p5  ;;  %p2057_p2 = por %p2056_p1, %p2055_p13 }
  0x49   : > { %p2053_p11 = pneg %p2052_p9  ;;  %p2059_p6 = por %p2058_p3, %p2057_p2 }
  0x4b   : > { %p2060_p7 = pnand %p2059_p6, %p2053_p11 }
  0x4d   : > { %2063 = shalt.err (!%p2060_p7)
}
  0x4e   : > { %s2064_s17 = scalar_lea.vmem %s2266_s24, %s2253_s22  ;;  %s2121_s16 = smov [#allocation3]  }
  0x4f   : > { %p2065_p10 = scmp.ne.s32.totalorder %s2266_s24, %s2064_s17  ;;  %s2068_s11 = sshll.u32 %s2121_s16, 4  ;;  %s2069_s11 = int_to_ptr.vmem [resolvable:$false] %s2068_s11 }
  0x50   : > { %s2070_s25 = scalar_lea.vmem %s2069_s11, 6144  ;;  %p2071_p4 = scmp.lt.s32.totalorder %s2266_s24, %s2069_s11 }
  0x51   : > { %p2066_p12 = pnand %p2065_p10, %p1610_p5  ;;  %p2072_p8 = scmp.lt.s32.totalorder %s2070_s25, %s2064_s17 }
  0x53   : > { %p2067_p0 = pneg %p2066_p12  ;;  %p2073_p9 = por %p2072_p8, %p2071_p4 }
  0x55   : > { %p2074_p13 = pnand %p2073_p9, %p2067_p0 }
  0x57   : > { %2077 = shalt.err (!%p2074_p13)
}
  0x58   : > { %s2122_s26 = smov 1536   ;;  %s2123_s9 = smov 96  }
  0x59   : > { %272 = dma.hbm_to_vmem [thread:$0]  (%p1610_p5), %s2264_s8, %s2253_s22, %s2266_s24, %s2256_s23, %s2122_s26, %s2122_s26, %s2123_s9  }
  0x5a PF: > { %p2413_p11 = scmp.ne.s32.totalorder %s2410_s14, 0 }
  0x5b   : > { %s280_s15 = sand.u32 (!%p2413_p11), 1, %s2108_s27   ;;  %p2414_p1 = scmp.ne.s32.totalorder (!%p2413_p11), %s2409_s13, 0 }
  0x5c   : > { %278 = sbr.rel (%p2413_p11) target bundleno = 814 (0x32e), region = 48  ;;  %s281_s19 = scalar_lea.sflag (!%p2413_p11), [#allocation4], %s280_s15 }
  0x5d   : > { %s1868_s18 = smul.u32 (!%p2413_p11), 192, %s280_s15 }
  0x5f   : > { %s2296_s20 = scalar_lea.vmem (!%p2413_p11), [#allocation3], %s1868_s18 }
  0x63   : > { %2095 = dma.done.wait (%p2414_p1), %s281_s19, 3072  }
  0x64   : > { %2097 = vsyncadd (%p2414_p1), %s281_s19, 4294964224  ;;  %p2415_p2 = scmp.ne.s32.totalorder %s2408_s12, 0 }
  0x66   : > { %2099 = dma.done.wait (%p2415_p2), [#allocation6], 12032  }
  0x67   : > { %2101 = vsyncadd (%p2415_p2), [#allocation6], 4294955264  ;;  %v1920_v1 = vld [vmem:[#allocation5 + $0x40] sm:$0xff]   ;;  %v1924_v5 = vld [vmem:[#allocation5 + $0x48] sm:$0xff]   ;;  %vm1126_vm0 = vcmask 752640   ;;  %vm1130_vm1 = vcmask 1045504  }
  0x68   : > { %v1921_v2 = vld [vmem:[#allocation5 + $0xc0] sm:$0xff]   ;;  %1727 = vmatprep.subr.bf16.mxu0 %v1920_v1  ;;  %v1925_v6 = vld [vmem:[#allocation5 + $0xc8] sm:$0xff]   ;;  %v1928_v9 = vld [vmem:[#allocation5 + $0x50] sm:$0xff]   ;;  %vm2126_vm2 = vmmov 0   ;;  %vm1506_vm3 = vcmask 523264   ;;  %s1616_s23 = sshll.u32 %s1602_s6, 1 }
  0x69   : > { %v1922_v3 = vld [vmem:[#allocation5] sm:$0xff]   ;;  %1749 = vmatprep.subr.bf16.mxu1 %v1921_v2  ;;  %v1926_v7 = vld [vmem:[#allocation5 + $0x8] sm:$0xff]   ;;  %v1929_v10 = vld [vmem:[#allocation5 + $0xd0] sm:$0xff]   ;;  %p326_p5 = scmp.lt.s32.totalorder %s1616_s23, 3  ;;  %vm1522_vm4 = vcmask 7168  }
  0x6a   : > { %v1923_v4 = vld [vmem:[#allocation5 + $0x80] sm:$0xff]   ;;  %1728 = vmatpush3.bf16.msra.mxu0 %v1922_v3  ;;  %v1927_v8 = vld [vmem:[#allocation5 + $0x88] sm:$0xff]   ;;  %v1930_v11 = vld [vmem:[#allocation5 + $0x10] sm:$0xff]  }
  0x6b   : > { %1750 = vmatpush3.bf16.msra.mxu1 %v1923_v4  ;;  %1729 = vmatprep.subr.bf16.mxu0 %v1924_v5  ;;  %v1931_v12 = vld [vmem:[#allocation5 + $0x90] sm:$0xff]   ;;  %v1932_v13 = vld [vmem:[#allocation5 + $0x58] sm:$0xff]   ;;  %v1936_v17 = vld [vmem:[#allocation5 + $0x60] sm:$0xff]   ;;  %s2423_s23 = smov (!%p326_p5, %s1616_s23), 3 }
  0x6c   : > { %1751 = vmatprep.subr.bf16.mxu1 %v1925_v6  ;;  %v1933_v14 = vld [vmem:[#allocation5 + $0xd8] sm:$0xff]   ;;  %v1937_v18 = vld [vmem:[#allocation5 + $0xe0] sm:$0xff]   ;;  %v1940_v21 = vld [vmem:[#allocation5 + $0x68] sm:$0xff]   ;;  %s1617_s24 = sshll.u32 %s2423_s23, 3 }
  0x6d   : > { %v1934_v15 = vld [vmem:[#allocation5 + $0x18] sm:$0xff]   ;;  %v1938_v19 = vld [vmem:[#allocation5 + $0x20] sm:$0xff]   ;;  %v1941_v22 = vld [vmem:[#allocation5 + $0xe8] sm:$0xff]   ;;  %s329_s17 = scalar_lea.vmem %s2402_s7, %s1617_s24 }
  0x6e   : > { %1730 = vmatpush3.bf16.msra.mxu0 %v1926_v7  ;;  %v1935_v16 = vld [vmem:[#allocation5 + $0x98] sm:$0xff]   ;;  %v1939_v20 = vld [vmem:[#allocation5 + $0xa0] sm:$0xff]   ;;  %v1942_v23 = vld [vmem:[#allocation5 + $0x28] sm:$0xff]  }
  0x6f   : > { %1752 = vmatpush3.bf16.msra.mxu1 %v1927_v8  ;;  %1731 = vmatprep.subr.bf16.mxu0 %v1928_v9  ;;  %v1943_v24 = vld [vmem:[#allocation5 + $0xa8] sm:$0xff]   ;;  %v1944_v25 = vld [vmem:[#allocation5 + $0x70] sm:$0xff]   ;;  %v1948_v29 = vld [vmem:[#allocation5 + $0x78] sm:$0xff]  }
  0x70   : > { %1753 = vmatprep.subr.bf16.mxu1 %v1929_v10  ;;  %v1945_v26 = vld [vmem:[#allocation5 + $0xf0] sm:$0xff]   ;;  %v1949_v30 = vld [vmem:[#allocation5 + $0xf8] sm:$0xff]   ;;  %v333_v33 = vld [vmem:[%s2296_s20 + $0x8] sm:$0xff] }
  0x71   : > { %v1946_v27 = vld [vmem:[#allocation5 + $0x30] sm:$0xff]   ;;  %v1950_v31 = vld [vmem:[#allocation5 + $0x38] sm:$0xff]   ;;  %v345_v34 = vld [vmem:[%s2296_s20 + $0x68] sm:$0xff] }
  0x72   : > { %1732 = vmatpush3.bf16.msra.mxu0 %v1930_v11  ;;  %v1947_v28 = vld [vmem:[#allocation5 + $0xb0] sm:$0xff]   ;;  %v1951_v32 = vld [vmem:[#allocation5 + $0xb8] sm:$0xff]   ;;  %v357_v36 = vpack.c.bf16 %v345_v34, %v333_v33  ;;  %v332_v38 = vld [vmem:[%s2296_s20] sm:$0xff] }
  0x73   : > { %1754 = vmatpush3.bf16.msra.mxu1 %v1931_v12  ;;  %1733 = vmatprep.subr.bf16.mxu0 %v1932_v13  ;;  %v335_v35 = vld [vmem:[%s2296_s20 + $0x18] sm:$0xff]  ;;  %v344_v39 = vld [vmem:[%s2296_s20 + $0x60] sm:$0xff]  ;;  %v334_v42 = vld [vmem:[%s2296_s20 + $0x10] sm:$0xff] }
  0x74   : > { %1755 = vmatprep.subr.bf16.mxu1 %v1933_v14  ;;  %v347_v37 = vld [vmem:[%s2296_s20 + $0x78] sm:$0xff]  ;;  %v356_v41 = vpack.c.bf16 %v344_v39, %v332_v38  ;;  %v346_v43 = vld [vmem:[%s2296_s20 + $0x70] sm:$0xff]  ;;  %1166 = vmatprep.mubr.bf16.mxu0 %v357_v36  ;;  %v1952_v45 = vld [vmem:[#allocation5 + $0x140] sm:$0xff]  }
  0x75   : > { %v359_v40 = vpack.c.bf16 %v347_v37, %v335_v35  ;;  %v358_v44 = vpack.c.bf16 %v346_v43, %v334_v42  ;;  %v1953_v46 = vld [vmem:[#allocation5 + $0x1c0] sm:$0xff]   ;;  %v1956_v49 = vld [vmem:[#allocation5 + $0x148] sm:$0xff]   ;;  %v1960_v53 = vld [vmem:[#allocation5 + $0x150] sm:$0xff]  }
  0x76   : > { %1734 = vmatpush3.bf16.msra.mxu0 %v1934_v15  ;;  %v1954_v47 = vld [vmem:[#allocation5 + $0x100] sm:$0xff]   ;;  %v1957_v50 = vld [vmem:[#allocation5 + $0x1c8] sm:$0xff]   ;;  %v1961_v54 = vld [vmem:[#allocation5 + $0x1d0] sm:$0xff]  }
  0x77   : > { %1756 = vmatpush3.bf16.msra.mxu1 %v1935_v16  ;;  %1735 = vmatprep.subr.bf16.mxu0 %v1936_v17  ;;  %v1955_v48 = vld [vmem:[#allocation5 + $0x180] sm:$0xff]   ;;  %v1958_v51 = vld [vmem:[#allocation5 + $0x108] sm:$0xff]   ;;  %v1962_v55 = vld [vmem:[#allocation5 + $0x110] sm:$0xff]  }
  0x78   : > { %1757 = vmatprep.subr.bf16.mxu1 %v1937_v18  ;;  %1207 = vmatprep.mubr.bf16.mxu1 %v359_v40  ;;  %v1959_v52 = vld [vmem:[#allocation5 + $0x188] sm:$0xff]   ;;  %v1963_v56 = vld [vmem:[#allocation5 + $0x190] sm:$0xff]   ;;  %v1964_v57 = vld [vmem:[#allocation5 + $0x158] sm:$0xff]  }
  0x79   : > { %v1965_v58 = vld [vmem:[#allocation5 + $0x1d8] sm:$0xff]   ;;  %v1968_v61 = vld [vmem:[#allocation5 + $0x160] sm:$0xff]   ;;  %v1972_v1 = vld [vmem:[#allocation5 + $0x168] sm:$0xff]  }
  0x7a   : > { %1736 = vmatpush3.bf16.msra.mxu0 %v1938_v19  ;;  %v1966_v59 = vld [vmem:[#allocation5 + $0x118] sm:$0xff]   ;;  %v1969_v62 = vld [vmem:[#allocation5 + $0x1e0] sm:$0xff]   ;;  %v1973_v2 = vld [vmem:[#allocation5 + $0x1e8] sm:$0xff]  }
  0x7b   : > { %1758 = vmatpush3.bf16.msra.mxu1 %v1939_v20  ;;  %1737 = vmatprep.subr.bf16.mxu0 %v1940_v21  ;;  %v1967_v60 = vld [vmem:[#allocation5 + $0x198] sm:$0xff]   ;;  %v1970_v63 = vld [vmem:[#allocation5 + $0x120] sm:$0xff]   ;;  %v1974_v3 = vld [vmem:[#allocation5 + $0x128] sm:$0xff]  }
  0x7c   : > { %1759 = vmatprep.subr.bf16.mxu1 %v1941_v22  ;;  %v1971_v0 = vld [vmem:[#allocation5 + $0x1a0] sm:$0xff]   ;;  %v1975_v4 = vld [vmem:[#allocation5 + $0x1a8] sm:$0xff]   ;;  %v1976_v5 = vld [vmem:[#allocation5 + $0x170] sm:$0xff]  }
  0x7d   : > { %v1977_v6 = vld [vmem:[#allocation5 + $0x1f0] sm:$0xff]   ;;  %v1980_v9 = vld [vmem:[#allocation5 + $0x178] sm:$0xff]   ;;  %v337_v13 = vld [vmem:[%s2296_s20 + $0x28] sm:$0xff] }
  0x7e   : > { %1738 = vmatpush3.bf16.msra.mxu0 %v1942_v23  ;;  %v1978_v7 = vld [vmem:[#allocation5 + $0x130] sm:$0xff]   ;;  %v1981_v10 = vld [vmem:[#allocation5 + $0x1f8] sm:$0xff]   ;;  %v349_v14 = vld [vmem:[%s2296_s20 + $0x88] sm:$0xff] }
  0x7f   : > { %1760 = vmatpush3.bf16.msra.mxu1 %v1943_v24  ;;  %1739 = vmatprep.subr.bf16.mxu0 %v1944_v25  ;;  %v1979_v8 = vld [vmem:[#allocation5 + $0x1b0] sm:$0xff]   ;;  %v1982_v11 = vld [vmem:[#allocation5 + $0x138] sm:$0xff]   ;;  %v361_v17 = vpack.c.bf16 %v349_v14, %v337_v13  ;;  %v336_v19 = vld [vmem:[%s2296_s20 + $0x20] sm:$0xff]  ;;  %v2124_v24 = vmov 0  }
  0x80   : > { %1761 = vmatprep.subr.bf16.mxu1 %v1945_v26  ;;  %v1983_v12 = vld [vmem:[#allocation5 + $0x1b8] sm:$0xff]   ;;  %v348_v20 = vld [vmem:[%s2296_s20 + $0x80] sm:$0xff]  ;;  %v338_v21 = vld [vmem:[%s2296_s20 + $0x30] sm:$0xff] }
  0x81   : > { %v339_v15 = vld [vmem:[%s2296_s20 + $0x38] sm:$0xff]  ;;  %v360_v22 = vpack.c.bf16 %v348_v20, %v336_v19  ;;  %v350_v23 = vld [vmem:[%s2296_s20 + $0x90] sm:$0xff]  ;;  %v1984_v26 = vld [vmem:[#allocation5 + $0x240] sm:$0xff]  }
  0x82   : > { %1740 = vmatpush3.bf16.msra.mxu0 %v1946_v27  ;;  %v351_v16 = vld [vmem:[%s2296_s20 + $0x98] sm:$0xff]  ;;  %v362_v25 = vpack.c.bf16 %v350_v23, %v338_v21  ;;  %v1985_v27 = vld [vmem:[#allocation5 + $0x200] sm:$0xff]   ;;  %v1991_v33 = vld [vmem:[#allocation5 + $0x210] sm:$0xff]  }
  0x83   : > { %1762 = vmatpush3.bf16.msra.mxu1 %v1947_v28  ;;  %1741 = vmatprep.subr.bf16.mxu0 %v1948_v29  ;;  %v363_v18 = vpack.c.bf16 %v351_v16, %v339_v15  ;;  %v1986_v28 = vld [vmem:[#allocation5 + $0x280] sm:$0xff]   ;;  %v1987_v29 = vld [vmem:[#allocation5 + $0x248] sm:$0xff]   ;;  %v1992_v34 = vld [vmem:[#allocation5 + $0x290] sm:$0xff]  }
  0x84   : > { %1763 = vmatprep.subr.bf16.mxu1 %v1949_v30  ;;  %v1988_v30 = vld [vmem:[#allocation5 + $0x208] sm:$0xff]   ;;  %v1993_v35 = vld [vmem:[#allocation5 + $0x258] sm:$0xff]   ;;  %v1996_v38 = vld [vmem:[#allocation5 + $0x260] sm:$0xff]  }
  0x85   : > { %v1994_v36 = vld [vmem:[#allocation5 + $0x218] sm:$0xff]   ;;  %v1997_v39 = vld [vmem:[#allocation5 + $0x220] sm:$0xff]   ;;  %v2000_v42 = vld [vmem:[#allocation5 + $0x228] sm:$0xff]  }
  0x86   : > { %1742 = vmatpush3.bf16.msra.mxu0 %v1950_v31  ;;  %v1989_v31 = vld [vmem:[#allocation5 + $0x288] sm:$0xff]   ;;  %v1995_v37 = vld [vmem:[#allocation5 + $0x298] sm:$0xff]   ;;  %v1998_v40 = vld [vmem:[#allocation5 + $0x2a0] sm:$0xff]  }
  0x87   : > { %1764 = vmatpush3.bf16.msra.mxu1 %v1951_v32  ;;  %1771 = vmatprep.subr.bf16.mxu0 %v1952_v45  ;;  %v1990_v32 = vld [vmem:[#allocation5 + $0x250] sm:$0xff]   ;;  %v2001_v43 = vld [vmem:[#allocation5 + $0x2a8] sm:$0xff]   ;;  %v1618_v16 = vld [vmem:[%s2397_s2] ss:$0 sm:$0xff] }
  0x88   : > { %1793 = vmatprep.subr.bf16.mxu1 %v1953_v46  ;;  %v2003_v45 = vld [vmem:[#allocation5 + $0x230] sm:$0xff]   ;;  %v341_v46 = vld [vmem:[%s2296_s20 + $0x48] sm:$0xff] }
  0x89   : > { %1167 = vmatmul.mubr.bf16.vlgmr.msra.gmra.mrb[0].mxu0 %v356_v41  ;;  %v1999_v41 = vld [vmem:[#allocation5 + $0x268] sm:$0xff]   ;;  %v2021_v13 = vld [vmem:[%s2398_s3 + $0x38] sm:$0xff]  }
  0x8a   : > { %1208 = vmatmul.mubr.bf16.vlgmr.msra.gmra.mrb[0].mxu1 %v358_v44  ;;  %1772 = vmatpush3.bf16.msra.mxu0 %v1954_v47  ;;  %v2002_v44 = vld [vmem:[#allocation5 + $0x270] sm:$0xff]   ;;  %v353_v47 = vld [vmem:[%s2296_s20 + $0xa8] sm:$0xff] }
  0x8b   : > { %1794 = vmatpush3.bf16.msra.mxu1 %v1955_v48  ;;  %1773 = vmatprep.subr.bf16.mxu0 %v1956_v49  ;;  %v2004_v48 = vld [vmem:[#allocation5 + $0x2b0] sm:$0xff]   ;;  %v2005_v49 = vld [vmem:[#allocation5 + $0x278] sm:$0xff]  }
  0x8c   : > { %1795 = vmatprep.subr.bf16.mxu1 %v1957_v50  ;;  %1248 = vmatprep.mubr.bf16.mxu0 %v361_v17  ;;  %v365_v50 = vpack.c.bf16 %v353_v47, %v341_v46 }
  0x8d   : > { %1289 = vmatprep.mubr.bf16.mxu1 %v363_v18 }
  0x8e   : > { %1774 = vmatpush3.bf16.msra.mxu0 %v1958_v51  ;;  %v2006_v51 = vld [vmem:[#allocation5 + $0x238] sm:$0xff]  }
  0x8f   : > { %1796 = vmatpush3.bf16.msra.mxu1 %v1959_v52  ;;  %1775 = vmatprep.subr.bf16.mxu0 %v1960_v53  ;;  %v340_v52 = vld [vmem:[%s2296_s20 + $0x40] sm:$0xff] }
  0x90   : > { %1797 = vmatprep.subr.bf16.mxu1 %v1961_v54  ;;  %v352_v53 = vld [vmem:[%s2296_s20 + $0xa0] sm:$0xff]  ;;  %v2007_v54 = vld [vmem:[#allocation5 + $0x2b8] sm:$0xff]  }
  0x92   : > { %1776 = vmatpush3.bf16.msra.mxu0 %v1962_v55  ;;  %v364_v55 = vpack.c.bf16 %v352_v53, %v340_v52 }
  0x93   : > { %1798 = vmatpush3.bf16.msra.mxu1 %v1963_v56  ;;  %1777 = vmatprep.subr.bf16.mxu0 %v1964_v57  ;;  %v343_v56 = vld [vmem:[%s2296_s20 + $0x58] sm:$0xff] }
  0x94   : > { %1799 = vmatprep.subr.bf16.mxu1 %v1965_v58  ;;  %v355_v57 = vld [vmem:[%s2296_s20 + $0xb8] sm:$0xff]  ;;  %v2008_v58 = vld [vmem:[#allocation5 + $0x2c0] sm:$0xff]  }
  0x96   : > { %1778 = vmatpush3.bf16.msra.mxu0 %v1966_v59  ;;  %v367_v59 = vpack.c.bf16 %v355_v57, %v343_v56 }
  0x97   : > { %1800 = vmatpush3.bf16.msra.mxu1 %v1967_v60  ;;  %1779 = vmatprep.subr.bf16.mxu0 %v1968_v61  ;;  %v2009_v60 = vld [vmem:[#allocation5 + $0x2c8] sm:$0xff]   ;;  %v2010_v61 = vld [vmem:[#allocation5 + $0x2d0] sm:$0xff]  }
  0x98   : > { %1801 = vmatprep.subr.bf16.mxu1 %v1969_v62  ;;  %v2011_v62 = vld [vmem:[#allocation5 + $0x2d8] sm:$0xff]  }
  0x9a   : > { %1780 = vmatpush3.bf16.msra.mxu0 %v1970_v63  ;;  %v2012_v63 = vld [vmem:[#allocation5 + $0x2e0] sm:$0xff]  }
  0x9b   : > { %1802 = vmatpush3.bf16.msra.mxu1 %v1971_v0  ;;  %1781 = vmatprep.subr.bf16.mxu0 %v1972_v1  ;;  %v2013_v0 = vld [vmem:[#allocation5 + $0x2e8] sm:$0x3f]   ;;  %v342_v1 = vld [vmem:[%s2296_s20 + $0x50] sm:$0xff] }
  0x9c   : > { %1803 = vmatprep.subr.bf16.mxu1 %v1973_v2  ;;  %v354_v2 = vld [vmem:[%s2296_s20 + $0xb0] sm:$0xff] }
  0x9e   : > { %1782 = vmatpush3.bf16.msra.mxu0 %v1974_v3  ;;  %v1132_v3 = vsel %vm1130_vm1, %v2013_v0, 0  ;;  %v1714_v0 = vld [vmem:[%s2399_s4] ss:$0 sm:$0xff] }
  0x9f   : > { %1804 = vmatpush3.bf16.msra.mxu1 %v1975_v4  ;;  %1783 = vmatprep.subr.bf16.mxu0 %v1976_v5  ;;  %v366_v4 = vpack.c.bf16 %v354_v2, %v342_v1  ;;  %v2014_v5 = vld [vmem:[%s2398_s3] sm:$0xff]  }
  0xa0   : > { %1805 = vmatprep.subr.bf16.mxu1 %v1977_v6  ;;  %v2125_v6 = vmov 0.0  }
  0xa2   : > { %1784 = vmatpush3.bf16.msra.mxu0 %v1978_v7  ;;  %v2015_v7 = vld [vmem:[%s2398_s3 + $0x8] sm:$0xff]  }
  0xa3   : > { %1806 = vmatpush3.bf16.msra.mxu1 %v1979_v8  ;;  %1785 = vmatprep.subr.bf16.mxu0 %v1980_v9  ;;  %v2016_v8 = vld [vmem:[%s2398_s3 + $0x10] sm:$0xff]   ;;  %v2017_v9 = vld [vmem:[%s2398_s3 + $0x18] sm:$0xff]  }
  0xa4   : > { %1807 = vmatprep.subr.bf16.mxu1 %v1981_v10  ;;  %v2018_v10 = vld [vmem:[%s2398_s3 + $0x20] sm:$0xff]  }
  0xa6   : > { %1786 = vmatpush3.bf16.msra.mxu0 %v1982_v11  ;;  %v2019_v11 = vld [vmem:[%s2398_s3 + $0x28] sm:$0xff]  }
  0xa7   : > { %1808 = vmatpush3.bf16.msra.mxu1 %v1983_v12  ;;  %1815 = vmatprep.subr.bf16.mxu0 %v1984_v26  ;;  %v2020_v12 = vld [vmem:[%s2398_s3 + $0x30] sm:$0xff]  }
  0xa8   : > { %1339 = vmatprep.subr.bf16.mxu1 %v2124_v24 }
  0xa9   : > { %1249 = vmatmul.mubr.bf16.vlgmr.msra.gmra.mrb[4].mxu0 %v360_v22 }
  0xaa   : > { %1290 = vmatmul.mubr.bf16.vlgmr.msra.gmra.mrb[4].mxu1 %v362_v25  ;;  %1816 = vmatpush3.bf16.msra.mxu0 %v1985_v27 }
  0xab   : > { %1340 = vmatpush1.bf16.msra.mxu1 %v1986_v28  ;;  %1817 = vmatprep.subr.bf16.mxu0 %v1987_v29 }
  0xac   : > { %1341 = vmatprep.subr.bf16.mxu1 %v2124_v24  ;;  %1330 = vmatprep.mubr.bf16.mxu0 %v365_v50 }
  0xad   : > { %1713 = vmatprep.mubr.msk.bf16.mxu1 %vm1126_vm0, %v367_v59 }
  0xae   : > { %1818 = vmatpush3.bf16.msra.mxu0 %v1988_v30 }
  0xaf   : > { %1342 = vmatpush1.bf16.msra.mxu1 %v1989_v31  ;;  %1819 = vmatprep.subr.bf16.mxu0 %v1990_v32 }
  0xb0   : > { %1343 = vmatprep.subr.bf16.mxu1 %v2124_v24 }
  0xb2   : > { %1820 = vmatpush3.bf16.msra.mxu0 %v1991_v33 }
  0xb3   : > { %1344 = vmatpush1.bf16.msra.mxu1 %v1992_v34  ;;  %1821 = vmatprep.subr.bf16.mxu0 %v1993_v35 }
  0xb4   : > { %1345 = vmatprep.subr.bf16.mxu1 %v2124_v24 }
  0xb6   : > { %1822 = vmatpush3.bf16.msra.mxu0 %v1994_v36 }
  0xb7   : > { %1346 = vmatpush1.bf16.msra.mxu1 %v1995_v37  ;;  %1823 = vmatprep.subr.bf16.mxu0 %v1996_v38 }
  0xb8   : > { %1347 = vmatprep.subr.bf16.mxu1 %v2124_v24 }
  0xba   : > { %1824 = vmatpush3.bf16.msra.mxu0 %v1997_v39 }
  0xbb   : > { %1348 = vmatpush1.bf16.msra.mxu1 %v1998_v40  ;;  %1825 = vmatprep.subr.bf16.mxu0 %v1999_v41 }
  0xbc   : > { %1349 = vmatprep.subr.bf16.mxu1 %v2124_v24 }
  0xbe   : > { %1826 = vmatpush3.bf16.msra.mxu0 %v2000_v42 }
  0xbf   : > { %1350 = vmatpush1.bf16.msra.mxu1 %v2001_v43  ;;  %1827 = vmatprep.subr.bf16.mxu0 %v2002_v44 }
  0xc0   : > { %1351 = vmatprep.subr.bf16.mxu1 %v2124_v24 }
  0xc2   : > { %1828 = vmatpush3.bf16.msra.mxu0 %v2003_v45 }
  0xc3   : > { %1352 = vmatpush1.bf16.msra.mxu1 %v2004_v48  ;;  %1829 = vmatprep.subr.bf16.mxu0 %v2005_v49 }
  0xc4   : > { %1353 = vmatprep.subr.bf16.mxu1 %v2124_v24 }
  0xc6   : > { %1830 = vmatpush3.bf16.msra.mxu0 %v2006_v51 }
  0xc7   : > { %1354 = vmatpush1.bf16.msra.mxu1 %v2007_v54  ;;  %1846 = vmatprep.subr.bf16.mxu0 %v2125_v6 }
  0xc8   : > { %1355 = vmatprep.subr.bf16.mxu1 %v2124_v24 }
  0xc9   : > { %1331 = vmatmul.mubr.bf16.vlgmr.msra.gmra.mrb[8].mxu0 %v364_v55 }
  0xca   : > { %1847 = vmatpush3.bf16.msra.mxu0 %v2014_v5  ;;  %1862 = vmatprep.mubr.msk.bf16.mxu0 %vm2126_vm2, %v2125_v6  ;;  %v1723_v5 = vld [vmem:[%s2400_s5] ss:$0 sm:$0xff] }
  0xcb   : > { %1356 = vmatpush1.bf16.msra.mxu1 %v2008_v58  ;;  %1848 = vmatprep.subr.bf16.mxu0 %v2125_v6 }
  0xcc   : > { %1357 = vmatprep.subr.bf16.mxu1 %v2124_v24 }
  0xce   : > { %1849 = vmatpush3.bf16.msra.mxu0 %v2015_v7 }
  0xcf   : > { %1358 = vmatpush1.bf16.msra.mxu1 %v2009_v60  ;;  %1850 = vmatprep.subr.bf16.mxu0 %v2125_v6 }
  0xd0   : > { %1359 = vmatprep.subr.bf16.mxu1 %v2124_v24 }
  0xd2   : > { %1851 = vmatpush3.bf16.msra.mxu0 %v2016_v8 }
  0xd3   : > { %1360 = vmatpush1.bf16.msra.mxu1 %v2010_v61  ;;  %1852 = vmatprep.subr.bf16.mxu0 %v2125_v6 }
  0xd4   : > { %1361 = vmatprep.subr.bf16.mxu1 %v2124_v24 }
  0xd6   : > { %1853 = vmatpush3.bf16.msra.mxu0 %v2017_v9 }
  0xd7   : > { %1362 = vmatpush1.bf16.msra.mxu1 %v2011_v62  ;;  %1854 = vmatprep.subr.bf16.mxu0 %v2125_v6 }
  0xd8   : > { %1363 = vmatprep.subr.bf16.mxu1 %v2124_v24 }
  0xda   : > { %1855 = vmatpush3.bf16.msra.mxu0 %v2018_v10 }
  0xdb   : > { %1364 = vmatpush1.bf16.msra.mxu1 %v2012_v63  ;;  %1856 = vmatprep.subr.bf16.mxu0 %v2125_v6 }
  0xdc   : > { %1365 = vmatprep.subr.bf16.mxu1 %v2124_v24 }
  0xde   : > { %1857 = vmatpush3.bf16.msra.mxu0 %v2019_v11 }
  0xdf   : > { %1366 = vmatpush1.bf16.msra.mxu1 %v1132_v3  ;;  %1858 = vmatprep.subr.bf16.mxu0 %v2125_v6 }
  0xe2   : > { %1372 = vmatmul.mubr.bf16.vlgmr.msra.gmra.mrb[8].mxu1 %v366_v4  ;;  %1859 = vmatpush3.bf16.msra.mxu0 %v2020_v12 }
  0xe3   : > { %1860 = vmatprep.subr.bf16.mxu0 %v2125_v6 }
  0xe6   : > { %1861 = vmatpush3.bf16.msra.mxu0 %v2021_v13 }
 0x15c   : > { %v1743_v14 = vpop.f32.mrb[0].mxu0 }
 0x15d   : > { %v1765_v15 = vpop.f32.mrb[0].mxu1  ;;  %v1744_v17 = vpop.f32.mrb[1].mxu0 }
 0x15e   : > { %v1745_v18 = vadd.f32 %v1744_v17, %v1743_v14  ;;  %v1766_v19 = vpop.f32.mrb[1].mxu1  ;;  %v1746_v20 = vpop.f32.mrb[2].mxu0  ;;  %v1724_v14 = vld [vmem:[#allocation2] ss:$0 sm:$0xff] }
 0x15f   : > { %v1767_v21 = vadd.f32 %v1766_v19, %v1765_v15  ;;  %v1768_v22 = vpop.f32.mrb[2].mxu1  ;;  %v1747_v23 = vpop.f32.mrb[3].mxu0 }
 0x160   : > { %v1169_v24 = vadd.f32 %v1745_v18, %v1618_v16  ;;  %v1748_v25 = vadd.f32 %v1747_v23, %v1746_v20  ;;  %v1769_v26 = vpop.f32.mrb[3].mxu1 }
 0x161   : > { %v1770_v27 = vadd.f32 %v1769_v26, %v1768_v22 }
 0x162   : > { %v1210_v28 = vadd.f32 %v1767_v21, %v1169_v24  ;;  %v1172_v29 = vadd.f32 %v1748_v25, %v1618_v16 }
 0x164   : > { %v1213_v30 = vadd.f32 %v1770_v27, %v1172_v29 }
 0x17c   : > { %v1787_v31 = vpop.f32.mrb[4].mxu0 }
 0x17d   : > { %v1809_v32 = vpop.f32.mrb[4].mxu1  ;;  %v1788_v33 = vpop.f32.mrb[5].mxu0 }
 0x17e   : > { %v1789_v34 = vadd.f32 %v1788_v33, %v1787_v31  ;;  %v1810_v35 = vpop.f32.mrb[5].mxu1  ;;  %v1790_v36 = vpop.f32.mrb[6].mxu0 }
 0x17f   : > { %v1811_v37 = vadd.f32 %v1810_v35, %v1809_v32  ;;  %v1812_v38 = vpop.f32.mrb[6].mxu1  ;;  %v1791_v39 = vpop.f32.mrb[7].mxu0 }
 0x180   : > { %v1251_v40 = vadd.f32 %v1789_v34, %v1210_v28  ;;  %v1792_v41 = vadd.f32 %v1791_v39, %v1790_v36  ;;  %v1813_v42 = vpop.f32.mrb[7].mxu1 }
 0x181   : > { %v1814_v43 = vadd.f32 %v1813_v42, %v1812_v38 }
 0x182   : > { %v1292_v44 = vadd.f32 %v1811_v37, %v1251_v40  ;;  %v1254_v45 = vadd.f32 %v1792_v41, %v1213_v30 }
 0x184   : > { %v1295_v46 = vadd.f32 %v1814_v43, %v1254_v45 }
 0x19c   : > { %v1831_v47 = vpop.f32.mrb[8].mxu0 }
 0x19d   : > { %v1832_v48 = vpop.f32.mrb[9].mxu0 }
 0x19e   : > { %v1833_v49 = vadd.f32 %v1832_v48, %v1831_v47  ;;  %v1834_v50 = vpop.f32.mrb[10].mxu0 }
 0x19f   : > { %v1835_v51 = vpop.f32.mrb[11].mxu0 }
 0x1a0   : > { %v1836_v52 = vadd.f32 %v1835_v51, %v1834_v50  ;;  %v1333_v53 = vadd.f32 %v1833_v49, %v1292_v44 }
 0x1a2   : > { %v1336_v54 = vadd.f32 %v1836_v52, %v1295_v46 }
 0x1b5   : > { %v1373_v55 = vpop.f32.mrb[8].mxu1 }
 0x1b6   : > { %v1374_v56 = vadd.f32 %v1373_v55, %v1333_v53  ;;  %v1375_v57 = vpop.f32.mrb[9].mxu1 }
 0x1b7   : > { %v1376_v58 = vpop.f32.mrb[10].mxu1 }
 0x1b8   : > { %v1377_v59 = vadd.f32 %v1376_v58, %v1336_v54  ;;  %v1378_v60 = vpop.f32.mrb[11].mxu1  ;;  %v1380_v61 = vmax.f32 %v1374_v56, 0.0 }
 0x1ba   : > { %v1381_v62 = vmax.f32 %v1377_v59, 0.0 }
 0x1bc   : > { %v1382_v63 = vpack.c.bf16 %v1381_v62, %v1380_v61 }
 0x1be   : > { %1863 = vmatmul.mubr.bf16.vlgmr.msra.gmra.mrb[12].mxu0 %v1382_v63 }
 0x291   : > { %v1488_v1 = vpop.f32.mrb[12].mxu0 }
 0x292   : > { %v1489_v2 = vadd.f32 %v1714_v0, %v1488_v1  ;;  %v1864_v3 = vpop.f32.mrb[13].mxu0 }
 0x293   : > { %v1491_v4 = vpop.f32.mrb[14].mxu0 }
 0x294   : > { %v1495_v6 = vmax.f32 %v1489_v2, 0.0  ;;  %v1492_v7 = vadd.f32 %v1714_v0, %v1491_v4  ;;  %v1865_v8 = vpop.f32.mrb[15].mxu0 }
 0x296   : > { %v1496_v9 = vmax.f32 %v1492_v7, 0.0  ;;  %v1504_v10 = vmul.f32 %v1723_v5, %v1495_v6 }
 0x298   : > { %v1507_v11 = vsel %vm1506_vm3, %v1504_v10, 0.0  ;;  %v1505_v12 = vmul.f32 %v1723_v5, %v1496_v9 }
 0x299   : > { %1508 = vadd.xlane.f32.xlu0 %v1507_v11 }
 0x29a   : > { %v1510_v13 = vsel %vm1506_vm3, %v1505_v12, 0.0 }
 0x29d   : > { %1511 = vadd.xlane.f32.xlu0 %v1510_v13 }
 0x326   : > { %v1509_v15 = vpop.xlane.xlu0 %1508 }
 0x327   : > { %v1520_v16 = vadd.f32 %v1724_v14, %v1509_v15 }
 0x329   : > { %1523 = vst.msk [vmem:[%s329_s17] sm:$0xff] %vm1522_vm4, %v1520_v16 }
 0x32a   : > { %v1512_v17 = vpop.xlane.xlu0 %1511 }
 0x32b   : > { %v1521_v18 = vadd.f32 %v1724_v14, %v1512_v17 }
 0x32d   : > { %1524 = vst.msk [vmem:[%s329_s17 + $0x8] sm:$0xff] %vm1522_vm4, %v1521_v18 }
 0x32e PF: > { %p20_p3 = scmp.ge.s32.totalorder %s2190_s30, 4   ;;  %s2416_s26 = smov %s2108_s27 }
 0x32f   : > { %s2417_s27 = smov %s2112_s28  ;;  %s2418_s28 = smov %s2200_s10 }
 0x330   : > { %s2419_s29 = smov %s2190_s30  ;;  %22 = sbr.rel (!%p20_p3) target bundleno = 7 (0x7), region = 92 }
 0x337   :  { %1547 = vsyncpa [#allocation4], 1 }
 0x338   :  { %1549 = vsyncpa [#allocation4 + $0x1], 1 }
 0x339   :  { %1550 = vsyncpa [#allocation6], 1 }

</bundles_post_ra>
